<compile_context>
chip_gen: v6e
topology: v6e:2x2x1
jax: 0.10.0
libtpu: 0.0.40
codegen_flags: <defaults>
</compile_context>

<pallas_src>
import jax
import jax.numpy as jnp
from jax.experimental import pallas as pl
from jax.experimental.pallas import tpu as pltpu


_TARGET_BLOCK_BYTES = 1 * 1024 * 1024   # per x block; total footprint ~8 MiB
_MIN_PALLAS_BYTES = 1 * 1024 * 1024     # below this, plain XLA wins


def _round_down(x, m):
    return (x // m) * m


# ----------------------------- kernels ------------------------------------ #

def _add_pe_kernel(x_ref, pe_ref, o_ref):
    # x_ref/o_ref: (tb, tn); pe_ref: (1, tn) broadcast over the batch axis.
    o_ref[...] = x_ref[...] + pe_ref[...]


def _add_pe_dropout_kernel(x_ref, pe_ref, mask_ref, o_ref):
    # mask_ref holds 0 or 1/keep_prob in x's dtype -> a single fused multiply.
    o_ref[...] = (x_ref[...] + pe_ref[...]) * mask_ref[...]


# --------------------------- PE construction ------------------------------- #

def make_positional_encoding(d_model, max_len=200, dtype=jnp.float32):
    """PE table identical to the PyTorch __init__ construction."""
    assert d_model % 2 == 0, "sin/cos interleave assumes an even d_model"
    pos = jnp.arange(max_len, dtype=jnp.float32)[:, None]                    # (L, 1)
    div = jnp.power(10000.0,
                    jnp.arange(0, d_model, 2, dtype=jnp.float32) / d_model)  # (D/2,)
    angles = pos / div                                                       # (L, D/2)
    pe = jnp.stack([jnp.sin(angles), jnp.cos(angles)], axis=-1)              # interleave
    return pe.reshape(max_len, d_model).astype(dtype)


# ----------------------------- tiling -------------------------------------- #

def _choose_tiles_2d(B, N, itemsize, target_bytes):
    """(tb, tn) block for a (B, N) array.

    tn is a multiple of 128 (or the full N when N % 128 != 0); tb is a
    multiple of 8 or the full B.  The budget also covers the 8-sublane-padded
    PE block so the double-buffered working set stays small.
    """
    max_elems = max(target_bytes // itemsize, 8 * 128)

    if N % 128 != 0:
        # Last dim must be full-extent; tile only the batch axis.
        rows = max(1, max_elems // N)
        if rows >= B or B <= 8:
            return B, N
        return max(8, _round_down(rows, 8)), N

    if B * N <= max_elems:
        # Whole array fits one block.  Still split the lane axis in two when
        # possible so a v7x megacore gets >= 2 grid steps (free on v5e/v6e).
        if N >= 256:
            return B, _round_down(max(128, N // 2), 128)
        return B, N

    if B > 8 and 8 * N <= max_elems:
        # Tile the batch axis only (keeps PE fully resident per N-chunk).
        return min(B, _round_down(max_elems // N, 8)), N

    tb = min(B, 8)
    tn = max(128, _round_down(min(N, max_elems // max(tb, 1)), 128))
    # Cap tn so the sublane-padded (8, tn) PE buffer fits the same budget.
    tn = min(tn, max(128, _round_down(max_elems // 8, 128)))
    return tb, tn


# ----------------------------- wrapper -------------------------------------- #

def positional_encoding_pe(x, pe, dropout_p=0.1, training=False, key=None,
                           target_block_bytes=_TARGET_BLOCK_BYTES,
                           min_pallas_bytes=_MIN_PALLAS_BYTES):
    """Forward of PositionalEncoding_PE: X + PE[:S], then dropout.

    Eval mode (training=False) or dropout_p == 0: dropout is the identity.
    Training mode: inverted dropout with keep prob (1 - dropout_p); the mask is
    drawn with jax.random (not bit-identical to torch's RNG stream).
    """
    B, S, D = x.shape
    itemsize = jnp.dtype(x.dtype).itemsize
    keep_prob = 1.0 - float(dropout_p)
    use_dropout = training and dropout_p > 0.0
    if use_dropout and key is None:
        key = jax.random.PRNGKey(0)

    pe_slice = pe[:S, :]
    if pe_slice.dtype != x.dtype:
        pe_slice = pe_slice.astype(x.dtype)

    total_bytes = B * S * D * itemsize
    if total_bytes < min_pallas_bytes:
        # Tiny-input bailout: pallas_call dispatch would dominate.
        y = x + pe_slice[None, :, :]
        if use_dropout:
            keep = jax.random.bernoulli(key, keep_prob, shape=y.shape)
            y = jnp.where(keep, y * (1.0 / keep_prob), jnp.zeros_like(y))
        return y

    # Lane-dense layout: fold (seq, d_model) into one last axis.
    N = S * D
    x_in = x.reshape(B, N)
    pe_in = pe_slice.reshape(1, N)
    tb, tn = _choose_tiles_2d(B, N, itemsize, target_block_bytes)

    # PE chunk is the OUTER grid axis, batch the inner one -> the PE block
    # index is constant across the inner loop and stays VMEM-resident.
    grid = (pl.cdiv(N, tn), pl.cdiv(B, tb))
    x_spec = pl.BlockSpec((tb, tn), lambda jn, ib: (ib, jn))
    pe_spec = pl.BlockSpec((1, tn), lambda jn, ib: (0, jn))
    o_spec = pl.BlockSpec((tb, tn), lambda jn, ib: (ib, jn))
    out_struct = jax.ShapeDtypeStruct((B, N), x.dtype)

    cparams = pltpu.CompilerParams(
        dimension_semantics=("parallel", "parallel"))

    if not use_dropout:
        out = pl.pallas_call(
            _add_pe_kernel,
            out_shape=out_struct,
            grid=grid,
            in_specs=[x_spec, pe_spec],
            out_specs=o_spec,
            compiler_params=cparams,
        )(x_in, pe_in)
    else:
        keep = jax.random.bernoulli(key, keep_prob, shape=(B, N))
        mask = jnp.where(keep, jnp.asarray(1.0 / keep_prob, x.dtype),
                         jnp.asarray(0.0, x.dtype)).astype(x.dtype)
        out = pl.pallas_call(
            _add_pe_dropout_kernel,
            out_shape=out_struct,
            grid=grid,
            in_specs=[x_spec, pe_spec, x_spec],
            out_specs=o_spec,
            compiler_params=cparams,
        )(x_in, pe_in, mask)

    return out.reshape(B, S, D)


# ------------------------------- tests -------------------------------------- #

if __name__ == "__main__":
    # Small shapes consistent with the module: batch=2, seq=8, d_model=32.
    B, S, D = 2, 8, 32
    MAX_LEN = 200

    key = jax.random.PRNGKey(0)
    x = jax.random.normal(key, (B, S, D), dtype=jnp.float32)
    pe = make_positional_encoding(D, max_len=MAX_LEN)
    ref = x + pe[None, :S, :]

    # 1) Eval-mode forward through the Pallas kernel (force past the bailout).
    out = jax.block_until_ready(
        positional_encoding_pe(x, pe, training=False, min_pallas_bytes=0))
    assert out.shape == (B, S, D)
    assert jnp.allclose(out, ref, atol=1e-6, rtol=1e-6)

    # 2) Default path at this tiny size takes the XLA bailout; same result.
    out_xla = jax.block_until_ready(positional_encoding_pe(x, pe, training=False))
    assert jnp.allclose(out_xla, ref, atol=1e-6, rtol=1e-6)

    # 3) Multi-step lane-dense tiling (artificially small target block).
    B2, S2, D2 = 4, 64, 32
    x2 = jax.random.normal(jax.random.PRNGKey(1), (B2, S2, D2), dtype=jnp.float32)
    pe2 = make_positional_encoding(D2, max_len=MAX_LEN)
    out2 = jax.block_until_ready(
        positional_encoding_pe(x2, pe2, training=False,
                               target_block_bytes=8 * 1024,
                               min_pallas_bytes=0))
    ref2 = x2 + pe2[None, :S2, :]
    assert jnp.allclose(out2, ref2, atol=1e-6, rtol=1e-6)

    # 4) Non-128-multiple lane axis (S*D = 192): full-extent last dim path.
    B3, S3, D3 = 2, 8, 24
    x3 = jax.random.normal(jax.random.PRNGKey(2), (B3, S3, D3), dtype=jnp.float32)
    pe3 = make_positional_encoding(D3, max_len=MAX_LEN)
    out3 = jax.block_until_ready(
        positional_encoding_pe(x3, pe3, training=False, min_pallas_bytes=0))
    ref3 = x3 + pe3[None, :S3, :]
    assert jnp.allclose(out3, ref3, atol=1e-6, rtol=1e-6)

    # 5) Training-mode forward with fused dropout: every element must be either
    #    exactly dropped (0) or the eval value scaled by 1/(1-p).
    p = 0.1
    out_tr = jax.block_until_ready(
        positional_encoding_pe(x, pe, dropout_p=p, training=True,
                               key=jax.random.PRNGKey(42), min_pallas_bytes=0))
    scaled = ref / (1.0 - p)
    is_dropped = jnp.isclose(out_tr, 0.0, atol=1e-6)
    is_kept = jnp.isclose(out_tr, scaled, atol=1e-5, rtol=1e-5)
    assert bool(jnp.all(is_dropped | is_kept))
    assert bool(jnp.any(is_kept))

    print("KERNEL_OK")
</pallas_src>

<mosaic_0001>
module attributes {stable_mosaic.version = 11 : i64} {
  func.func @_add_pe_kernel(%arg0: i32, %arg1: i32, %arg2: memref<2x128xf32, #tpu.memory_space<vmem>>, %arg3: memref<1x128xf32, #tpu.memory_space<vmem>>, %arg4: memref<2x128xf32, #tpu.memory_space<vmem>>) attributes {dimension_semantics = [#tpu.dimension_semantics<parallel>, #tpu.dimension_semantics<parallel>], iteration_bounds = array<i64: 2, 1>, scalar_prefetch = 0 : i64, scratch_operands = 0 : i64, tpu.core_type = #tpu.core_type<tc>, window_params = [{transform_indices = @transform_0, window_bounds = array<i64: 2, 128>}, {transform_indices = @transform_1, window_bounds = array<i64: 1, 128>}, {transform_indices = @transform_2, window_bounds = array<i64: 2, 128>}]} {
    %c0 = arith.constant 0 : index
    %c0_0 = arith.constant 0 : index
    %0 = vector.load %arg2[%c0, %c0_0] : memref<2x128xf32, #tpu.memory_space<vmem>>, vector<2x128xf32>
    %c0_1 = arith.constant 0 : index
    %c0_2 = arith.constant 0 : index
    %1 = vector.load %arg3[%c0_1, %c0_2] : memref<1x128xf32, #tpu.memory_space<vmem>>, vector<1x128xf32>
    %2 = vector.broadcast %1 : vector<1x128xf32> to vector<2x128xf32>
    %3 = arith.addf %0, %2 : vector<2x128xf32>
    %c0_3 = arith.constant 0 : index
    %c0_4 = arith.constant 0 : index
    %4 = vector.load %arg4[%c0_3, %c0_4] : memref<2x128xf32, #tpu.memory_space<vmem>>, vector<2x128xf32>
    tpu.vector_store %arg4[%c0_3, %c0_4], %3 {strides = array<i32>} : memref<2x128xf32, #tpu.memory_space<vmem>>, vector<2x128xf32>,
    return
  }
  func.func @transform_0(%arg0: i32, %arg1: i32) -> (i32, i32) {
    %c0_i32 = arith.constant 0 : i32
    return %arg1, %arg0 : i32, i32
  }
  func.func @transform_1(%arg0: i32, %arg1: i32) -> (i32, i32) {
    %c0_i32 = arith.constant 0 : i32
    %c0_i32_0 = arith.constant 0 : i32
    return %c0_i32, %arg0 : i32, i32
  }
  func.func @transform_2(%arg0: i32, %arg1: i32) -> (i32, i32) {
    %c0_i32 = arith.constant 0 : i32
    return %arg1, %arg0 : i32, i32
  }
}

</mosaic_0001>

<bundles_post_ra>
// kernel: tpu_custom_call.1
= control target key start
LH: loop header
LB: loop body
LE: loop exit
PB: predicated region body
PF: predicated region fallthrough
CT: control target
= control target key end

     0   :  { %7 = vsyncpa [#allocation3], 0  ;;  %s745_s0 = inlined_call_operand.hbm [shape: f32[2,256], index: 0, kind: input, shape index: {}]   ;;  %s746_s1 = inlined_call_operand.hbm [shape: f32[1,256], index: 1, kind: input, shape index: {}]   ;;  %s747_s2 = inlined_call_operand.hbm [shape: f32[2,256], index: 2, kind: output, shape index: {}]  }
   0x1   :  { %9 = vsyncpa [#allocation3 + $0x1], 0 }
   0x2   :  { %10 = vsyncpa [#allocation6], 0 }
   0x3   :  { %12 = vsyncpa [#allocation6 + $0x1], 0 }
   0x4   :  { %13 = vsyncpa [#allocation4], 0 }
   0x5   :  { %15 = vsyncpa [#allocation4 + $0x1], 0  ;;  %s581_s9 = smov 0   ;;  %s583_s10 = smov 0  }
   0x6   :  { %s585_s11 = smov 0   ;;  %s587_s12 = smov 0  }
   0x7   :  { %s589_s13 = smov 0   ;;  %s591_s14 = smov 0  }
   0x8 LB: > { %s339_s15 = sadd.s32 4294967295, %s561_s14   ;;  %s340_s16 = sadd.s32 4294967294, %s561_s14   ;;  %s561_s14 = sphi %s591_s14, %s21_s14   ;;  %s557_s13 = sphi %s589_s13, %s759_s13   ;;  %s553_s12 = sphi %s587_s12, %s758_s12   ;;  %s549_s11 = sphi %s585_s11, %s757_s11   ;;  %s545_s10 = sphi %s583_s10, %s756_s10   ;;  %s541_s9 = sphi %s581_s9, %s755_s9  }
   0x9   : > { %s33_s17 = sadd.s32 1, %s557_s13  ;;  %s42_s18 = sadd.s32 1, %s549_s11 }
   0xa   : > { %p35_p0 = scmp.ge.s32.totalorder %s33_s17, 2  ;;  %p49_p1 = scmp.ne.s32.totalorder %s549_s11, %s545_s10 }
   0xb   : > { %p50_p2 = scmp.eq.s32.totalorder %s561_s14, 0  ;;  %p55_p3 = scmp.ne.s32.totalorder %s545_s10, %s541_s9 }
   0xc   : > { %s761_s17 = smov (%p35_p0, %s33_s17), 0  ;;  %p56_p5 = scmp.eq.s32.totalorder %s339_s15, 0 }
   0xd   : > { %p622_p4 = por %p50_p2, %p49_p1  ;;  %s38_s20 = ssub.s32 %s557_s13, %s761_s17 }
   0xe   : > { %p107_p6 = scmp.eq.s32.totalorder %s339_s15, 1  ;;  %p40_p7 = scmp.eq.s32.totalorder %s38_s20, 0 }
   0xf   : > { %p628_p8 = por %p56_p5, %p55_p3  ;;  %p113_p10 = scmp.eq.s32.totalorder %s340_s16, 1 }
  0x10   : > { %p632_p9 = por %p107_p6, %p49_p1  ;;  %p371_p13 = scmp.lt.s32.totalorder %s561_s14, 2 }
  0x11   : > { %s637_s23 = scalar_select %p40_p7, %s549_s11, %s42_s18  }
  0x12   : > { %p639_p11 = por %p113_p10, %p55_p3  ;;  %s646_s25 = sand.u32 1, %s549_s11  }
  0x13   : > { %s343_s26 = sshll.u32 %s646_s25, 1  ;;  %s344_s27 = sshll.u32 %s557_s13, 5 }
  0x14   : > { %s144_s30 = scalar_lea.hbm %s745_s0, %s344_s27  ;;  %s137_s3 = scalar_lea.vmem [#allocation2], %s343_s26 }
  0x15   : > { %s146_s4 = sshll.u32 %s137_s3, 4  ;;  %p655_p0 = pnand %p371_p13, %p622_p4  ;;  %s147_s4 = int_to_ptr.vmem [resolvable:$true] %s146_s4 }
  0x16   : > { %p346_p1 = scmp.ge.s32.totalorder %s561_s14, 1  ;;  %p168_p2 = scmp.lt.s32.totalorder %s561_s14, 3 }
  0x17   : > { %s134_s6 = scalar_lea.sflag [#allocation3], %s646_s25  ;;  %p423_p3 = pneg %p655_p0 }
  0x18   : > { %s434_s7 = scalar_lea.vmem %s147_s4, 32  ;;  %s563_s8 = smov [#allocation2]  }
  0x19   : > { %p435_p5 = scmp.ne.s32.totalorder %s147_s4, %s434_s7  ;;  %s439_s15 = sshll.u32 %s563_s8, 4  ;;  %s440_s15 = int_to_ptr.vmem [resolvable:$false] %s439_s15 }
  0x1a   : > { %s441_s16 = scalar_lea.vmem %s440_s15, 64  ;;  %p442_p4 = scmp.lt.s32.totalorder %s147_s4, %s440_s15 }
  0x1b   : > { %p437_p6 = pnand %p435_p5, %p423_p3  ;;  %p443_p10 = scmp.lt.s32.totalorder %s441_s16, %s434_s7 }
  0x1d   : > { %p438_p7 = pneg %p437_p6  ;;  %p444_p13 = por %p443_p10, %p442_p4 }
  0x1f   : > { %p445_p12 = pnand %p444_p13, %p438_p7 }
  0x21   : > { %448 = shalt.err (!%p445_p12)
}
  0x22   : > { %363 = dma.hbm_to_vmem [thread:$0]  (!%p655_p0), %s144_s30, 32, %s147_s4, %s134_s6  }
  0x23   : > { %p673_p5 = pnand %p346_p1, %p168_p2  ;;  %s345_s19 = sshll.u32 %s557_s13, 4 }
  0x24   : > { %s156_s20 = scalar_lea.vmem [#allocation5], %s646_s25  ;;  %s161_s29 = scalar_lea.hbm %s746_s1, %s345_s19 }
  0x25   : > { %s163_s26 = sshll.u32 %s156_s20, 4  ;;  %s154_s3 = scalar_lea.sflag [#allocation6], %s646_s25  ;;  %s164_s26 = int_to_ptr.vmem [resolvable:$true] %s163_s26 }
  0x26   : > { %s462_s7 = scalar_lea.vmem %s164_s26, 16  ;;  %s564_s30 = smov [#allocation5]  }
  0x27   : > { %p463_p12 = scmp.ne.s32.totalorder %s164_s26, %s462_s7  ;;  %s467_s4 = sshll.u32 %s564_s30, 4  ;;  %s468_s4 = int_to_ptr.vmem [resolvable:$false] %s467_s4 }
  0x28   : > { %s469_s6 = scalar_lea.vmem %s468_s4, 32  ;;  %p470_p1 = scmp.lt.s32.totalorder %s164_s26, %s468_s4 }
  0x29   : > { %p465_p6 = pnand %p463_p12, %p423_p3  ;;  %p471_p2 = scmp.lt.s32.totalorder %s469_s6, %s462_s7 }
  0x2b   : > { %p466_p7 = pneg %p465_p6  ;;  %p472_p4 = por %p471_p2, %p470_p1 }
  0x2d   : > { %p473_p10 = pnand %p472_p4, %p466_p7 }
  0x2f   : > { %476 = shalt.err (!%p473_p10)
}
  0x30   : > { %366 = dma.hbm_to_vmem [thread:$0]  (!%p655_p0), %s161_s29, 16, %s164_s26, %s154_s3  }
  0x31   : > { %172 = sbr.rel (%p673_p5) target bundleno = 81 (0x51), region = 28  ;;  %s691_s25 = sand.u32 (!%p673_p5), 1, %s545_s10  }
  0x32   : > { %s347_s8 = sshll.u32 (!%p673_p5), %s691_s25, 1  ;;  %s175_s15 = scalar_lea.sflag (!%p673_p5), [#allocation3], %s691_s25 }
  0x33   : > { %s178_s16 = scalar_lea.vmem (!%p673_p5), [#allocation2], %s347_s8 }
  0x36   : > { %528 = dma.done.wait (%p628_p8), %s175_s15, 32  }
  0x37   : > { %530 = vsyncadd (%p628_p8), %s175_s15, 4294967264  ;;  %s184_s5 = scalar_lea.sflag [#allocation6], %s691_s25  ;;  %s186_s18 = scalar_lea.vmem [#allocation5], %s691_s25 }
  0x38   : > { %532 = dma.done.wait (%p628_p8), %s184_s5, 16  }
  0x39   : > { %534 = vsyncadd (%p628_p8), %s184_s5, 4294967280  ;;  %s210_s19 = scalar_lea.vmem [#allocation7], %s347_s8  ;;  %s351_s26 = sshll.u32 %s553_s12, 5  ;;  %v211_v0 = vld [vmem:[%s178_s16] sm:$0x3] }
  0x3a   : > { %s237_s20 = sshll.u32 %s210_s19, 4  ;;  %v349_v1 = vld [vmem:[%s186_s18] ss:$0 sm:$0xff]  ;;  %s235_s29 = scalar_lea.hbm %s747_s2, %s351_s26  ;;  %s238_s20 = int_to_ptr.vmem [resolvable:$true] %s237_s20 }
  0x3b   : > { %v219_v2 = vadd.f32 %v349_v1, %v211_v0  ;;  %s222_s3 = scalar_lea.sflag [#allocation4], %s691_s25  ;;  %s477_s7 = scalar_lea.vmem %s238_s20, 32 }
  0x3c   : > { %p478_p0 = scmp.ne.s32.totalorder %s238_s20, %s477_s7  ;;  %s565_s21 = smov [#allocation7]  }
  0x3d   : > { %220 = vst [vmem:[%s210_s19] sm:$0x3] %v219_v2  ;;  %s481_s30 = sshll.u32 %s565_s21, 4  ;;  %s482_s30 = int_to_ptr.vmem [resolvable:$false] %s481_s30 }
  0x3e   : > { %p479_p8 = pnand %p478_p0, %p632_p9  ;;  %s483_s4 = scalar_lea.vmem %s482_s30, 64 }
  0x3f   : > { %p484_p13 = scmp.lt.s32.totalorder %s238_s20, %s482_s30  ;;  %p485_p5 = scmp.lt.s32.totalorder %s483_s4, %s477_s7 }
  0x40   : > { %p480_p3 = pneg %p479_p8 }
  0x41   : > { %p486_p12 = por %p485_p5, %p484_p13 }
  0x43   : > { %p487_p6 = pnand %p486_p12, %p480_p3 }
  0x45   : > { %490 = shalt.err (!%p487_p6)
}
  0x46   : > { %s491_s12 = scalar_lea.hbm %s235_s29, 32  ;;  %s495_s8 = scalar_lea.hbm %s747_s2, 64 }
  0x47   : > { %p492_p7 = scmp.ne.s32.totalorder %s235_s29, %s491_s12  ;;  %p496_p4 = scmp.lt.s32.totalorder %s235_s29, %s747_s2 }
  0x48   : > { %p497_p10 = scmp.lt.s32.totalorder %s495_s8, %s491_s12 }
  0x49   : > { %p493_p1 = pnand %p492_p7, %p632_p9 }
  0x4a   : > { %p498_p0 = por %p497_p10, %p496_p4 }
  0x4b   : > { %p494_p2 = pneg %p493_p1 }
  0x4d   : > { %p499_p8 = pnand %p498_p0, %p494_p2 }
  0x4f   : > { %502 = shalt.err (!%p499_p8)
}
  0x50   : > { %358 = dma.vmem_to_hbm [thread:$0]  (%p632_p9), %s238_s20, 32, %s235_s29, %s222_s3  }
  0x51 PF: > { %s249_s5 = sand.u32 1, %s541_s9   ;;  %p754_p3 = scmp.ge.s32.totalorder %s561_s14, 2 }
  0x52   : > { %s250_s18 = scalar_lea.sflag [#allocation4], %s249_s5 }
  0x53   : > { %p368_p13 = pnand %p754_p3, %p639_p11 }
  0x55   : > { %p369_p5 = pneg %p368_p13 }
  0x57   : > { %536 = dma.done.wait (%p369_p5), %s250_s18, 32  }
  0x58   : > { %538 = vsyncadd (%p369_p5), %s250_s18, 4294967264  ;;  %s21_s14 = sadd.s32 1, %s561_s14   ;;  %s755_s9 = smov %s545_s10 }
  0x59   : > { %p18_p12 = scmp.ge.s32.totalorder %s21_s14, 4   ;;  %s756_s10 = smov %s549_s11 }
  0x5a   : > { %s757_s11 = smov %s637_s23  ;;  %s758_s12 = smov %s557_s13 }
  0x5b   : > { %s759_s13 = smov %s761_s17  ;;  %20 = sbr.rel (!%p18_p12) target bundleno = 8 (0x8), region = 86 }
  0x60   :  { %255 = vsyncpa [#allocation3], 1 }
  0x61   :  { %257 = vsyncpa [#allocation3 + $0x1], 1 }
  0x62   :  { %258 = vsyncpa [#allocation6], 1 }
  0x63   :  { %260 = vsyncpa [#allocation6 + $0x1], 1 }
  0x64   :  { %261 = vsyncpa [#allocation4], 1 }
  0x65   :  { %263 = vsyncpa [#allocation4 + $0x1], 1 }

</bundles_post_ra>
